<compile_context>
chip_gen: v7x
topology: tpu7x:2x2x1
jax: 0.10.0
libtpu: 0.0.40
codegen_flags: <defaults>
</compile_context>

<pallas_src>
import functools

import jax
import jax.numpy as jnp
from jax.experimental import pallas as pl
from jax.experimental.pallas import tpu as pltpu

# ---- small hyperparameters consistent with the module's forward ----
VOCAB = 128        # vocab_size  -> lane-dense logits (last dim = 128)
EMBED = 32         # embed_size
HIDDEN = 32        # hidden_size
SEQ = 8            # seq_len
BATCH = 2          # batch


def _lstm_kernel(tok_ref, embw_ref, whh_ref, bl_ref, wout_ref, bo_ref,
                 o_ref, xp_ref, *, seq, batch, hidden, vocab):
    sb = seq * batch

    # ---- embedding gather + input projection fused into ONE MXU push ----
    # one-hot(tok) selects rows of (emb_table @ W_ih^T), which equals
    # emb @ W_ih^T (up to a single wrapper-side reassociation).
    tok = tok_ref[...]                                              # (S*B, 1) int32
    vocab_ids = jax.lax.broadcasted_iota(jnp.int32, (sb, vocab), 1)
    onehot = (tok == vocab_ids).astype(jnp.float32)                 # (S*B, V)
    xp_ref[...] = (jnp.dot(onehot, embw_ref[...],
                           preferred_element_type=jnp.float32)
                   + bl_ref[...])                                   # (S*B, 4H)

    whh = whh_ref[...]                                              # (H, 4H)
    wout = wout_ref[...]                                            # (H, V)
    bo = bo_ref[...]                                                # (1, V)

    h = jnp.zeros((batch, hidden), jnp.float32)
    c = jnp.zeros((batch, hidden), jnp.float32)

    # The LSTM recurrence is inherently sequential; seq=8 -> static unroll.
    for t in range(seq):
        r = t * batch
        # one fused recurrent matmul per step; result stays in vregs
        gates = xp_ref[r:r + batch, :] + jnp.dot(
            h, whh, preferred_element_type=jnp.float32)             # (B, 4H)

        # two full-width EUP passes, then static lane slices (exact)
        sig = jax.nn.sigmoid(gates)
        th = jnp.tanh(gates)
        i = sig[:, 0:hidden]
        f = sig[:, hidden:2 * hidden]
        g = th[:, 2 * hidden:3 * hidden]
        o = sig[:, 3 * hidden:4 * hidden]

        c = f * c + i * g
        h = o * jnp.tanh(c)

        # fused output projection: per-step matmul + lane-dense (V=128) store
        o_ref[r:r + batch, :] = (jnp.dot(h, wout,
                                         preferred_element_type=jnp.float32)
                                 + bo).astype(o_ref.dtype)


def lstm_seq_model(tokens, emb_table, w_ih, w_hh, b_ih, b_hh, w_out, b_out):
    """tokens: (S, B) int32 -> logits (S, B, V). Weights given in PyTorch layout."""
    s, b = tokens.shape
    v, e = emb_table.shape
    h4 = w_ih.shape[0]
    h = h4 // 4
    hp = jax.lax.Precision.HIGHEST

    # Flattened row order r = t*B + b matches the (S, B, ...) reference layout.
    tok_col = tokens.reshape(s * b, 1).astype(jnp.int32)
    # One-time (V,E)@(E,4H) precompute folding the embedding gather into the
    # input projection (done once in XLA, off the kernel's critical path).
    emb_w = jnp.dot(emb_table, w_ih.T, precision=hp)  # (V, 4H)
    whh_t = w_hh.T                                    # (H, 4H)
    b_lstm = (b_ih + b_hh).reshape(1, h4)             # biases fused once
    wout_t = w_out.T                                  # (H, V)
    bo = b_out.reshape(1, v)

    kernel = functools.partial(_lstm_kernel, seq=s, batch=b, hidden=h, vocab=v)
    vmem_spec = lambda: pl.BlockSpec(memory_space=pltpu.MemorySpace.VMEM)

    logits2d = pl.pallas_call(
        kernel,
        out_shape=jax.ShapeDtypeStruct((s * b, v), jnp.float32),
        in_specs=[vmem_spec() for _ in range(6)],     # whole arrays resident in VMEM
        out_specs=vmem_spec(),
        scratch_shapes=[
            pltpu.VMEM((s * b, h4), jnp.float32),     # xp: fused input projections
        ],
    )(tok_col, emb_w, whh_t, b_lstm, wout_t, bo)
    return logits2d.reshape(s, b, v)


def _reference(tokens, emb_table, w_ih, w_hh, b_ih, b_hh, w_out, b_out):
    """Pure-JAX reference with identical math (f32-accurate matmuls)."""
    hp = jax.lax.Precision.HIGHEST
    hsz = w_hh.shape[1]
    emb = emb_table[tokens]                          # (S, B, E) exact gather

    def step(carry, x_t):
        hh, cc = carry
        gates = (jnp.dot(x_t, w_ih.T, precision=hp) + b_ih
                 + jnp.dot(hh, w_hh.T, precision=hp) + b_hh)
        i = jax.nn.sigmoid(gates[:, 0:hsz])
        f = jax.nn.sigmoid(gates[:, hsz:2 * hsz])
        g = jnp.tanh(gates[:, 2 * hsz:3 * hsz])
        o = jax.nn.sigmoid(gates[:, 3 * hsz:4 * hsz])
        cc = f * cc + i * g
        hh = o * jnp.tanh(cc)
        return (hh, cc), hh

    bsz = tokens.shape[1]
    h0 = jnp.zeros((bsz, hsz), jnp.float32)
    _, hs = jax.lax.scan(step, (h0, h0), emb)        # hs: (S, B, H)
    return jnp.dot(hs, w_out.T, precision=hp) + b_out


if __name__ == "__main__":
    key = jax.random.PRNGKey(0)
    kt, ke, k1, k2, k3, k4, k5, k6 = jax.random.split(key, 8)

    tokens = jax.random.randint(kt, (SEQ, BATCH), 0, VOCAB, dtype=jnp.int32)
    emb_table = jax.random.normal(ke, (VOCAB, EMBED), dtype=jnp.float32)
    w_ih = jax.random.normal(k1, (4 * HIDDEN, EMBED), dtype=jnp.float32) * 0.3
    w_hh = jax.random.normal(k2, (4 * HIDDEN, HIDDEN), dtype=jnp.float32) * 0.3
    b_ih = jax.random.normal(k3, (4 * HIDDEN,), dtype=jnp.float32) * 0.1
    b_hh = jax.random.normal(k4, (4 * HIDDEN,), dtype=jnp.float32) * 0.1
    w_out = jax.random.normal(k5, (VOCAB, HIDDEN), dtype=jnp.float32) * 0.2
    b_out = jax.random.normal(k6, (VOCAB,), dtype=jnp.float32) * 0.1

    logits = lstm_seq_model(tokens, emb_table, w_ih, w_hh, b_ih, b_hh, w_out, b_out)
    logits = jax.block_until_ready(logits)

    ref = _reference(tokens, emb_table, w_ih, w_hh, b_ih, b_hh, w_out, b_out)
    assert logits.shape == (SEQ, BATCH, VOCAB)
    err = float(jnp.max(jnp.abs(logits - ref)))
    assert jnp.allclose(logits, ref, atol=1e-4, rtol=1e-3), f"max abs err {err}"

    print("KERNEL_OK")
</pallas_src>

<mosaic_0001>
module attributes {stable_mosaic.version = 11 : i64} {
  func.func @_lstm_kernel(%arg0: memref<16x1xi32, #tpu.memory_space<vmem>>, %arg1: memref<128x128xf32, #tpu.memory_space<vmem>>, %arg2: memref<32x128xf32, #tpu.memory_space<vmem>>, %arg3: memref<1x128xf32, #tpu.memory_space<vmem>>, %arg4: memref<32x128xf32, #tpu.memory_space<vmem>>, %arg5: memref<1x128xf32, #tpu.memory_space<vmem>>, %arg6: memref<16x128xf32, #tpu.memory_space<vmem>>, %arg7: memref<16x128xf32, #tpu.memory_space<vmem>>) attributes {dimension_semantics = [], scalar_prefetch = 0 : i64, scratch_operands = 1 : i64, tpu.core_type = #tpu.core_type<tc>} {
    %c0 = arith.constant 0 : index
    %c0_0 = arith.constant 0 : index
    %0 = vector.load %arg0[%c0, %c0_0] : memref<16x1xi32, #tpu.memory_space<vmem>>, vector<16x1xi32>
    %1 = tpu.iota {dimensions = array<i32: 1>} : vector<16x128xi32>
    %2 = vector.broadcast %0 : vector<16x1xi32> to vector<16x128xi32>
    %3 = arith.cmpi eq, %2, %1 : vector<16x128xi32>
    %4 = arith.extui %3 : vector<16x128xi1> to vector<16x128xi32>
    %5 = arith.sitofp %4 : vector<16x128xi32> to vector<16x128xf32>
    %c0_1 = arith.constant 0 : index
    %c0_2 = arith.constant 0 : index
    %6 = vector.load %arg1[%c0_1, %c0_2] : memref<128x128xf32, #tpu.memory_space<vmem>>, vector<128x128xf32>
    %cst = arith.constant dense<0.000000e+00> : vector<16x128xf32>
    %7 = tpu.matmul %5, %6, %cst {dimension_numbers = #tpu.dot_dimension_numbers<[1], [0], [0], [1], [0, 0, 1, 1], [], []>} : vector<16x128xf32>, vector<128x128xf32>, vector<16x128xf32> -> vector<16x128xf32>
    %c0_3 = arith.constant 0 : index
    %c0_4 = arith.constant 0 : index
    %8 = vector.load %arg3[%c0_3, %c0_4] : memref<1x128xf32, #tpu.memory_space<vmem>>, vector<1x128xf32>
    %9 = vector.broadcast %8 : vector<1x128xf32> to vector<16x128xf32>
    %10 = arith.addf %7, %9 : vector<16x128xf32>
    %c0_5 = arith.constant 0 : index
    %c0_6 = arith.constant 0 : index
    %11 = vector.load %arg7[%c0_5, %c0_6] : memref<16x128xf32, #tpu.memory_space<vmem>>, vector<16x128xf32>
    tpu.vector_store %arg7[%c0_5, %c0_6], %10 {strides = array<i32>} : memref<16x128xf32, #tpu.memory_space<vmem>>, vector<16x128xf32>,
    %c0_7 = arith.constant 0 : index
    %c0_8 = arith.constant 0 : index
    %12 = vector.load %arg2[%c0_7, %c0_8] : memref<32x128xf32, #tpu.memory_space<vmem>>, vector<32x128xf32>
    %c0_9 = arith.constant 0 : index
    %c0_10 = arith.constant 0 : index
    %13 = vector.load %arg4[%c0_9, %c0_10] : memref<32x128xf32, #tpu.memory_space<vmem>>, vector<32x128xf32>
    %c0_11 = arith.constant 0 : index
    %c0_12 = arith.constant 0 : index
    %14 = vector.load %arg5[%c0_11, %c0_12] : memref<1x128xf32, #tpu.memory_space<vmem>>, vector<1x128xf32>
    %cst_13 = arith.constant 0.000000e+00 : f32
    %15 = vector.broadcast %cst_13 : f32 to vector<2x32xf32>
    %cst_14 = arith.constant 0.000000e+00 : f32
    %16 = vector.broadcast %cst_14 : f32 to vector<2x32xf32>
    %c0_15 = arith.constant 0 : index
    %c0_16 = arith.constant 0 : index
    %17 = vector.load %arg7[%c0_15, %c0_16] : memref<16x128xf32, #tpu.memory_space<vmem>>, vector<2x128xf32>
    %cst_17 = arith.constant dense<0.000000e+00> : vector<2x128xf32>
    %18 = tpu.matmul %15, %12, %cst_17 {dimension_numbers = #tpu.dot_dimension_numbers<[1], [0], [0], [1], [0, 0, 1, 1], [], []>} : vector<2x32xf32>, vector<32x128xf32>, vector<2x128xf32> -> vector<2x128xf32>
    %19 = arith.addf %17, %18 : vector<2x128xf32>
    %20 = arith.negf %19 : vector<2x128xf32>
    %21 = math.exp %20 : vector<2x128xf32>
    %cst_18 = arith.constant 1.000000e+00 : f32
    %22 = vector.broadcast %cst_18 : f32 to vector<2x128xf32>
    %23 = arith.addf %22, %21 : vector<2x128xf32>
    %24 = arith.divf %22, %23 : vector<2x128xf32>
    %25 = math.tanh %19 : vector<2x128xf32>
    %26 = vector.extract_strided_slice %24 {offsets = [0, 0], sizes = [2, 32], strides = [1, 1]} : vector<2x128xf32> to vector<2x32xf32>
    %27 = vector.extract_strided_slice %24 {offsets = [0, 32], sizes = [2, 32], strides = [1, 1]} : vector<2x128xf32> to vector<2x32xf32>
    %28 = vector.extract_strided_slice %25 {offsets = [0, 64], sizes = [2, 32], strides = [1, 1]} : vector<2x128xf32> to vector<2x32xf32>
    %29 = vector.extract_strided_slice %24 {offsets = [0, 96], sizes = [2, 32], strides = [1, 1]} : vector<2x128xf32> to vector<2x32xf32>
    %30 = arith.mulf %27, %16 : vector<2x32xf32>
    %31 = arith.mulf %26, %28 : vector<2x32xf32>
    %32 = arith.addf %30, %31 : vector<2x32xf32>
    %33 = math.tanh %32 : vector<2x32xf32>
    %34 = arith.mulf %29, %33 : vector<2x32xf32>
    %cst_19 = arith.constant dense<0.000000e+00> : vector<2x128xf32>
    %35 = tpu.matmul %34, %13, %cst_19 {dimension_numbers = #tpu.dot_dimension_numbers<[1], [0], [0], [1], [0, 0, 1, 1], [], []>} : vector<2x32xf32>, vector<32x128xf32>, vector<2x128xf32> -> vector<2x128xf32>
    %36 = vector.broadcast %14 : vector<1x128xf32> to vector<2x128xf32>
    %37 = arith.addf %35, %36 : vector<2x128xf32>
    %c0_20 = arith.constant 0 : index
    %c0_21 = arith.constant 0 : index
    %38 = vector.load %arg6[%c0_20, %c0_21] : memref<16x128xf32, #tpu.memory_space<vmem>>, vector<2x128xf32>
    tpu.vector_store %arg6[%c0_20, %c0_21], %37 {strides = array<i32>} : memref<16x128xf32, #tpu.memory_space<vmem>>, vector<2x128xf32>,
    %c2 = arith.constant 2 : index
    %c0_22 = arith.constant 0 : index
    %39 = vector.load %arg7[%c2, %c0_22] : memref<16x128xf32, #tpu.memory_space<vmem>>, vector<2x128xf32>
    %cst_23 = arith.constant dense<0.000000e+00> : vector<2x128xf32>
    %40 = tpu.matmul %34, %12, %cst_23 {dimension_numbers = #tpu.dot_dimension_numbers<[1], [0], [0], [1], [0, 0, 1, 1], [], []>} : vector<2x32xf32>, vector<32x128xf32>, vector<2x128xf32> -> vector<2x128xf32>
    %41 = arith.addf %39, %40 : vector<2x128xf32>
    %42 = arith.negf %41 : vector<2x128xf32>
    %43 = math.exp %42 : vector<2x128xf32>
    %cst_24 = arith.constant 1.000000e+00 : f32
    %44 = vector.broadcast %cst_24 : f32 to vector<2x128xf32>
    %45 = arith.addf %44, %43 : vector<2x128xf32>
    %46 = arith.divf %44, %45 : vector<2x128xf32>
    %47 = math.tanh %41 : vector<2x128xf32>
    %48 = vector.extract_strided_slice %46 {offsets = [0, 0], sizes = [2, 32], strides = [1, 1]} : vector<2x128xf32> to vector<2x32xf32>
    %49 = vector.extract_strided_slice %46 {offsets = [0, 32], sizes = [2, 32], strides = [1, 1]} : vector<2x128xf32> to vector<2x32xf32>
    %50 = vector.extract_strided_slice %47 {offsets = [0, 64], sizes = [2, 32], strides = [1, 1]} : vector<2x128xf32> to vector<2x32xf32>
    %51 = vector.extract_strided_slice %46 {offsets = [0, 96], sizes = [2, 32], strides = [1, 1]} : vector<2x128xf32> to vector<2x32xf32>
    %52 = arith.mulf %49, %32 : vector<2x32xf32>
    %53 = arith.mulf %48, %50 : vector<2x32xf32>
    %54 = arith.addf %52, %53 : vector<2x32xf32>
    %55 = math.tanh %54 : vector<2x32xf32>
    %56 = arith.mulf %51, %55 : vector<2x32xf32>
    %cst_25 = arith.constant dense<0.000000e+00> : vector<2x128xf32>
    %57 = tpu.matmul %56, %13, %cst_25 {dimension_numbers = #tpu.dot_dimension_numbers<[1], [0], [0], [1], [0, 0, 1, 1], [], []>} : vector<2x32xf32>, vector<32x128xf32>, vector<2x128xf32> -> vector<2x128xf32>
    %58 = vector.broadcast %14 : vector<1x128xf32> to vector<2x128xf32>
    %59 = arith.addf %57, %58 : vector<2x128xf32>
    %c2_26 = arith.constant 2 : index
    %c0_27 = arith.constant 0 : index
    %60 = vector.load %arg6[%c2_26, %c0_27] : memref<16x128xf32, #tpu.memory_space<vmem>>, vector<2x128xf32>
    tpu.vector_store %arg6[%c2_26, %c0_27], %59 {strides = array<i32>} : memref<16x128xf32, #tpu.memory_space<vmem>>, vector<2x128xf32>,
    %c4 = arith.constant 4 : index
    %c0_28 = arith.constant 0 : index
    %61 = vector.load %arg7[%c4, %c0_28] : memref<16x128xf32, #tpu.memory_space<vmem>>, vector<2x128xf32>
    %cst_29 = arith.constant dense<0.000000e+00> : vector<2x128xf32>
    %62 = tpu.matmul %56, %12, %cst_29 {dimension_numbers = #tpu.dot_dimension_numbers<[1], [0], [0], [1], [0, 0, 1, 1], [], []>} : vector<2x32xf32>, vector<32x128xf32>, vector<2x128xf32> -> vector<2x128xf32>
    %63 = arith.addf %61, %62 : vector<2x128xf32>
    %64 = arith.negf %63 : vector<2x128xf32>
    %65 = math.exp %64 : vector<2x128xf32>
    %cst_30 = arith.constant 1.000000e+00 : f32
    %66 = vector.broadcast %cst_30 : f32 to vector<2x128xf32>
    %67 = arith.addf %66, %65 : vector<2x128xf32>
    %68 = arith.divf %66, %67 : vector<2x128xf32>
    %69 = math.tanh %63 : vector<2x128xf32>
    %70 = vector.extract_strided_slice %68 {offsets = [0, 0], sizes = [2, 32], strides = [1, 1]} : vector<2x128xf32> to vector<2x32xf32>
    %71 = vector.extract_strided_slice %68 {offsets = [0, 32], sizes = [2, 32], strides = [1, 1]} : vector<2x128xf32> to vector<2x32xf32>
    %72 = vector.extract_strided_slice %69 {offsets = [0, 64], sizes = [2, 32], strides = [1, 1]} : vector<2x128xf32> to vector<2x32xf32>
    %73 = vector.extract_strided_slice %68 {offsets = [0, 96], sizes = [2, 32], strides = [1, 1]} : vector<2x128xf32> to vector<2x32xf32>
    %74 = arith.mulf %71, %54 : vector<2x32xf32>
    %75 = arith.mulf %70, %72 : vector<2x32xf32>
    %76 = arith.addf %74, %75 : vector<2x32xf32>
    %77 = math.tanh %76 : vector<2x32xf32>
    %78 = arith.mulf %73, %77 : vector<2x32xf32>
    %cst_31 = arith.constant dense<0.000000e+00> : vector<2x128xf32>
    %79 = tpu.matmul %78, %13, %cst_31 {dimension_numbers = #tpu.dot_dimension_numbers<[1], [0], [0], [1], [0, 0, 1, 1], [], []>} : vector<2x32xf32>, vector<32x128xf32>, vector<2x128xf32> -> vector<2x128xf32>
    %80 = vector.broadcast %14 : vector<1x128xf32> to vector<2x128xf32>
    %81 = arith.addf %79, %80 : vector<2x128xf32>
    %c4_32 = arith.constant 4 : index
    %c0_33 = arith.constant 0 : index
    %82 = vector.load %arg6[%c4_32, %c0_33] : memref<16x128xf32, #tpu.memory_space<vmem>>, vector<2x128xf32>
    tpu.vector_store %arg6[%c4_32, %c0_33], %81 {strides = array<i32>} : memref<16x128xf32, #tpu.memory_space<vmem>>, vector<2x128xf32>,
    %c6 = arith.constant 6 : index
    %c0_34 = arith.constant 0 : index
    %83 = vector.load %arg7[%c6, %c0_34] : memref<16x128xf32, #tpu.memory_space<vmem>>, vector<2x128xf32>
    %cst_35 = arith.constant dense<0.000000e+00> : vector<2x128xf32>
    %84 = tpu.matmul %78, %12, %cst_35 {dimension_numbers = #tpu.dot_dimension_numbers<[1], [0], [0], [1], [0, 0, 1, 1], [], []>} : vector<2x32xf32>, vector<32x128xf32>, vector<2x128xf32> -> vector<2x128xf32>
    %85 = arith.addf %83, %84 : vector<2x128xf32>
    %86 = arith.negf %85 : vector<2x128xf32>
    %87 = math.exp %86 : vector<2x128xf32>
    %cst_36 = arith.constant 1.000000e+00 : f32
    %88 = vector.broadcast %cst_36 : f32 to vector<2x128xf32>
    %89 = arith.addf %88, %87 : vector<2x128xf32>
    %90 = arith.divf %88, %89 : vector<2x128xf32>
    %91 = math.tanh %85 : vector<2x128xf32>
    %92 = vector.extract_strided_slice %90 {offsets = [0, 0], sizes = [2, 32], strides = [1, 1]} : vector<2x128xf32> to vector<2x32xf32>
    %93 = vector.extract_strided_slice %90 {offsets = [0, 32], sizes = [2, 32], strides = [1, 1]} : vector<2x128xf32> to vector<2x32xf32>
    %94 = vector.extract_strided_slice %91 {offsets = [0, 64], sizes = [2, 32], strides = [1, 1]} : vector<2x128xf32> to vector<2x32xf32>
    %95 = vector.extract_strided_slice %90 {offsets = [0, 96], sizes = [2, 32], strides = [1, 1]} : vector<2x128xf32> to vector<2x32xf32>
    %96 = arith.mulf %93, %76 : vector<2x32xf32>
    %97 = arith.mulf %92, %94 : vector<2x32xf32>
    %98 = arith.addf %96, %97 : vector<2x32xf32>
    %99 = math.tanh %98 : vector<2x32xf32>
    %100 = arith.mulf %95, %99 : vector<2x32xf32>
    %cst_37 = arith.constant dense<0.000000e+00> : vector<2x128xf32>
    %101 = tpu.matmul %100, %13, %cst_37 {dimension_numbers = #tpu.dot_dimension_numbers<[1], [0], [0], [1], [0, 0, 1, 1], [], []>} : vector<2x32xf32>, vector<32x128xf32>, vector<2x128xf32> -> vector<2x128xf32>
    %102 = vector.broadcast %14 : vector<1x128xf32> to vector<2x128xf32>
    %103 = arith.addf %101, %102 : vector<2x128xf32>
    %c6_38 = arith.constant 6 : index
    %c0_39 = arith.constant 0 : index
    %104 = vector.load %arg6[%c6_38, %c0_39] : memref<16x128xf32, #tpu.memory_space<vmem>>, vector<2x128xf32>
    tpu.vector_store %arg6[%c6_38, %c0_39], %103 {strides = array<i32>} : memref<16x128xf32, #tpu.memory_space<vmem>>, vector<2x128xf32>,
    %c8 = arith.constant 8 : index
    %c0_40 = arith.constant 0 : index
    %105 = vector.load %arg7[%c8, %c0_40] : memref<16x128xf32, #tpu.memory_space<vmem>>, vector<2x128xf32>
    %cst_41 = arith.constant dense<0.000000e+00> : vector<2x128xf32>
    %106 = tpu.matmul %100, %12, %cst_41 {dimension_numbers = #tpu.dot_dimension_numbers<[1], [0], [0], [1], [0, 0, 1, 1], [], []>} : vector<2x32xf32>, vector<32x128xf32>, vector<2x128xf32> -> vector<2x128xf32>
    %107 = arith.addf %105, %106 : vector<2x128xf32>
    %108 = arith.negf %107 : vector<2x128xf32>
    %109 = math.exp %108 : vector<2x128xf32>
    %cst_42 = arith.constant 1.000000e+00 : f32
    %110 = vector.broadcast %cst_42 : f32 to vector<2x128xf32>
    %111 = arith.addf %110, %109 : vector<2x128xf32>
    %112 = arith.divf %110, %111 : vector<2x128xf32>
    %113 = math.tanh %107 : vector<2x128xf32>
    %114 = vector.extract_strided_slice %112 {offsets = [0, 0], sizes = [2, 32], strides = [1, 1]} : vector<2x128xf32> to vector<2x32xf32>
    %115 = vector.extract_strided_slice %112 {offsets = [0, 32], sizes = [2, 32], strides = [1, 1]} : vector<2x128xf32> to vector<2x32xf32>
    %116 = vector.extract_strided_slice %113 {offsets = [0, 64], sizes = [2, 32], strides = [1, 1]} : vector<2x128xf32> to vector<2x32xf32>
    %117 = vector.extract_strided_slice %112 {offsets = [0, 96], sizes = [2, 32], strides = [1, 1]} : vector<2x128xf32> to vector<2x32xf32>
    %118 = arith.mulf %115, %98 : vector<2x32xf32>
    %119 = arith.mulf %114, %116 : vector<2x32xf32>
    %120 = arith.addf %118, %119 : vector<2x32xf32>
    %121 = math.tanh %120 : vector<2x32xf32>
    %122 = arith.mulf %117, %121 : vector<2x32xf32>
    %cst_43 = arith.constant dense<0.000000e+00> : vector<2x128xf32>
    %123 = tpu.matmul %122, %13, %cst_43 {dimension_numbers = #tpu.dot_dimension_numbers<[1], [0], [0], [1], [0, 0, 1, 1], [], []>} : vector<2x32xf32>, vector<32x128xf32>, vector<2x128xf32> -> vector<2x128xf32>
    %124 = vector.broadcast %14 : vector<1x128xf32> to vector<2x128xf32>
    %125 = arith.addf %123, %124 : vector<2x128xf32>
    %c8_44 = arith.constant 8 : index
    %c0_45 = arith.constant 0 : index
    %126 = vector.load %arg6[%c8_44, %c0_45] : memref<16x128xf32, #tpu.memory_space<vmem>>, vector<2x128xf32>
    tpu.vector_store %arg6[%c8_44, %c0_45], %125 {strides = array<i32>} : memref<16x128xf32, #tpu.memory_space<vmem>>, vector<2x128xf32>,
    %c10 = arith.constant 10 : index
    %c0_46 = arith.constant 0 : index
    %127 = vector.load %arg7[%c10, %c0_46] : memref<16x128xf32, #tpu.memory_space<vmem>>, vector<2x128xf32>
    %cst_47 = arith.constant dense<0.000000e+00> : vector<2x128xf32>
    %128 = tpu.matmul %122, %12, %cst_47 {dimension_numbers = #tpu.dot_dimension_numbers<[1], [0], [0], [1], [0, 0, 1, 1], [], []>} : vector<2x32xf32>, vector<32x128xf32>, vector<2x128xf32> -> vector<2x128xf32>
    %129 = arith.addf %127, %128 : vector<2x128xf32>
    %130 = arith.negf %129 : vector<2x128xf32>
    %131 = math.exp %130 : vector<2x128xf32>
    %cst_48 = arith.constant 1.000000e+00 : f32
    %132 = vector.broadcast %cst_48 : f32 to vector<2x128xf32>
    %133 = arith.addf %132, %131 : vector<2x128xf32>
    %134 = arith.divf %132, %133 : vector<2x128xf32>
    %135 = math.tanh %129 : vector<2x128xf32>
    %136 = vector.extract_strided_slice %134 {offsets = [0, 0], sizes = [2, 32], strides = [1, 1]} : vector<2x128xf32> to vector<2x32xf32>
    %137 = vector.extract_strided_slice %134 {offsets = [0, 32], sizes = [2, 32], strides = [1, 1]} : vector<2x128xf32> to vector<2x32xf32>
    %138 = vector.extract_strided_slice %135 {offsets = [0, 64], sizes = [2, 32], strides = [1, 1]} : vector<2x128xf32> to vector<2x32xf32>
    %139 = vector.extract_strided_slice %134 {offsets = [0, 96], sizes = [2, 32], strides = [1, 1]} : vector<2x128xf32> to vector<2x32xf32>
    %140 = arith.mulf %137, %120 : vector<2x32xf32>
    %141 = arith.mulf %136, %138 : vector<2x32xf32>
    %142 = arith.addf %140, %141 : vector<2x32xf32>
    %143 = math.tanh %142 : vector<2x32xf32>
    %144 = arith.mulf %139, %143 : vector<2x32xf32>
    %cst_49 = arith.constant dense<0.000000e+00> : vector<2x128xf32>
    %145 = tpu.matmul %144, %13, %cst_49 {dimension_numbers = #tpu.dot_dimension_numbers<[1], [0], [0], [1], [0, 0, 1, 1], [], []>} : vector<2x32xf32>, vector<32x128xf32>, vector<2x128xf32> -> vector<2x128xf32>
    %146 = vector.broadcast %14 : vector<1x128xf32> to vector<2x128xf32>
    %147 = arith.addf %145, %146 : vector<2x128xf32>
    %c10_50 = arith.constant 10 : index
    %c0_51 = arith.constant 0 : index
    %148 = vector.load %arg6[%c10_50, %c0_51] : memref<16x128xf32, #tpu.memory_space<vmem>>, vector<2x128xf32>
    tpu.vector_store %arg6[%c10_50, %c0_51], %147 {strides = array<i32>} : memref<16x128xf32, #tpu.memory_space<vmem>>, vector<2x128xf32>,
    %c12 = arith.constant 12 : index
    %c0_52 = arith.constant 0 : index
    %149 = vector.load %arg7[%c12, %c0_52] : memref<16x128xf32, #tpu.memory_space<vmem>>, vector<2x128xf32>
    %cst_53 = arith.constant dense<0.000000e+00> : vector<2x128xf32>
    %150 = tpu.matmul %144, %12, %cst_53 {dimension_numbers = #tpu.dot_dimension_numbers<[1], [0], [0], [1], [0, 0, 1, 1], [], []>} : vector<2x32xf32>, vector<32x128xf32>, vector<2x128xf32> -> vector<2x128xf32>
    %151 = arith.addf %149, %150 : vector<2x128xf32>
    %152 = arith.negf %151 : vector<2x128xf32>
    %153 = math.exp %152 : vector<2x128xf32>
    %cst_54 = arith.constant 1.000000e+00 : f32
    %154 = vector.broadcast %cst_54 : f32 to vector<2x128xf32>
    %155 = arith.addf %154, %153 : vector<2x128xf32>
    %156 = arith.divf %154, %155 : vector<2x128xf32>
    %157 = math.tanh %151 : vector<2x128xf32>
    %158 = vector.extract_strided_slice %156 {offsets = [0, 0], sizes = [2, 32], strides = [1, 1]} : vector<2x128xf32> to vector<2x32xf32>
    %159 = vector.extract_strided_slice %156 {offsets = [0, 32], sizes = [2, 32], strides = [1, 1]} : vector<2x128xf32> to vector<2x32xf32>
    %160 = vector.extract_strided_slice %157 {offsets = [0, 64], sizes = [2, 32], strides = [1, 1]} : vector<2x128xf32> to vector<2x32xf32>
    %161 = vector.extract_strided_slice %156 {offsets = [0, 96], sizes = [2, 32], strides = [1, 1]} : vector<2x128xf32> to vector<2x32xf32>
    %162 = arith.mulf %159, %142 : vector<2x32xf32>
    %163 = arith.mulf %158, %160 : vector<2x32xf32>
    %164 = arith.addf %162, %163 : vector<2x32xf32>
    %165 = math.tanh %164 : vector<2x32xf32>
    %166 = arith.mulf %161, %165 : vector<2x32xf32>
    %cst_55 = arith.constant dense<0.000000e+00> : vector<2x128xf32>
    %167 = tpu.matmul %166, %13, %cst_55 {dimension_numbers = #tpu.dot_dimension_numbers<[1], [0], [0], [1], [0, 0, 1, 1], [], []>} : vector<2x32xf32>, vector<32x128xf32>, vector<2x128xf32> -> vector<2x128xf32>
    %168 = vector.broadcast %14 : vector<1x128xf32> to vector<2x128xf32>
    %169 = arith.addf %167, %168 : vector<2x128xf32>
    %c12_56 = arith.constant 12 : index
    %c0_57 = arith.constant 0 : index
    %170 = vector.load %arg6[%c12_56, %c0_57] : memref<16x128xf32, #tpu.memory_space<vmem>>, vector<2x128xf32>
    tpu.vector_store %arg6[%c12_56, %c0_57], %169 {strides = array<i32>} : memref<16x128xf32, #tpu.memory_space<vmem>>, vector<2x128xf32>,
    %c14 = arith.constant 14 : index
    %c0_58 = arith.constant 0 : index
    %171 = vector.load %arg7[%c14, %c0_58] : memref<16x128xf32, #tpu.memory_space<vmem>>, vector<2x128xf32>
    %cst_59 = arith.constant dense<0.000000e+00> : vector<2x128xf32>
    %172 = tpu.matmul %166, %12, %cst_59 {dimension_numbers = #tpu.dot_dimension_numbers<[1], [0], [0], [1], [0, 0, 1, 1], [], []>} : vector<2x32xf32>, vector<32x128xf32>, vector<2x128xf32> -> vector<2x128xf32>
    %173 = arith.addf %171, %172 : vector<2x128xf32>
    %174 = arith.negf %173 : vector<2x128xf32>
    %175 = math.exp %174 : vector<2x128xf32>
    %cst_60 = arith.constant 1.000000e+00 : f32
    %176 = vector.broadcast %cst_60 : f32 to vector<2x128xf32>
    %177 = arith.addf %176, %175 : vector<2x128xf32>
    %178 = arith.divf %176, %177 : vector<2x128xf32>
    %179 = math.tanh %173 : vector<2x128xf32>
    %180 = vector.extract_strided_slice %178 {offsets = [0, 0], sizes = [2, 32], strides = [1, 1]} : vector<2x128xf32> to vector<2x32xf32>
    %181 = vector.extract_strided_slice %178 {offsets = [0, 32], sizes = [2, 32], strides = [1, 1]} : vector<2x128xf32> to vector<2x32xf32>
    %182 = vector.extract_strided_slice %179 {offsets = [0, 64], sizes = [2, 32], strides = [1, 1]} : vector<2x128xf32> to vector<2x32xf32>
    %183 = vector.extract_strided_slice %178 {offsets = [0, 96], sizes = [2, 32], strides = [1, 1]} : vector<2x128xf32> to vector<2x32xf32>
    %184 = arith.mulf %181, %164 : vector<2x32xf32>
    %185 = arith.mulf %180, %182 : vector<2x32xf32>
    %186 = arith.addf %184, %185 : vector<2x32xf32>
    %187 = math.tanh %186 : vector<2x32xf32>
    %188 = arith.mulf %183, %187 : vector<2x32xf32>
    %cst_61 = arith.constant dense<0.000000e+00> : vector<2x128xf32>
    %189 = tpu.matmul %188, %13, %cst_61 {dimension_numbers = #tpu.dot_dimension_numbers<[1], [0], [0], [1], [0, 0, 1, 1], [], []>} : vector<2x32xf32>, vector<32x128xf32>, vector<2x128xf32> -> vector<2x128xf32>
    %190 = vector.broadcast %14 : vector<1x128xf32> to vector<2x128xf32>
    %191 = arith.addf %189, %190 : vector<2x128xf32>
    %c14_62 = arith.constant 14 : index
    %c0_63 = arith.constant 0 : index
    %192 = vector.load %arg6[%c14_62, %c0_63] : memref<16x128xf32, #tpu.memory_space<vmem>>, vector<2x128xf32>
    tpu.vector_store %arg6[%c14_62, %c0_63], %191 {strides = array<i32>} : memref<16x128xf32, #tpu.memory_space<vmem>>, vector<2x128xf32>,
    return
  }
}

</mosaic_0001>

<bundles_post_ra>
// kernel: tpu_custom_call.1
= control target key start
LH: loop header
LB: loop body
LE: loop exit
PB: predicated region body
PF: predicated region fallthrough
CT: control target
= control target key end

     0   :  { %11 = vsyncpa [#allocation4], 0  ;;  %s2525_s0 = inlined_call_operand.vmem [shape: s32[16,1], index: 0, kind: input, shape index: {}]   ;;  %s2526_s1 = inlined_call_operand.hbm [shape: f32[128,128], index: 1, kind: input, shape index: {}]   ;;  %s2527_s2 = inlined_call_operand.hbm [shape: f32[32,128], index: 2, kind: input, shape index: {}]   ;;  %s2528_s3 = inlined_call_operand.hbm [shape: f32[1,128], index: 3, kind: input, shape index: {}]   ;;  %s2529_s4 = inlined_call_operand.vmem [shape: f32[32,128], index: 4, kind: input, shape index: {}]   ;;  %s2530_s5 = inlined_call_operand.vmem [shape: f32[1,128], index: 5, kind: input, shape index: {}]   ;;  %s2531_s6 = inlined_call_operand.hbm [shape: f32[16,128], index: 6, kind: output, shape index: {}]  }
   0x1   :  { %12 = vsyncpa [#allocation7], 0 }
   0x2   :  { %13 = vsyncpa [#allocation5], 0  ;;  %s2230_s21 = smov [#allocation6]   ;;  %s2231_s23 = smov [#allocation3]  }
   0x3   :  { %s33_s22 = sshll.u32 %s2230_s21, 4  ;;  %s21_s24 = sshll.u32 %s2231_s23, 4  ;;  %s34_s22 = int_to_ptr.vmem [resolvable:$true] %s33_s22  ;;  %s2278_s24 = int_to_ptr.vmem [resolvable:$true] %s21_s24 }
   0x4   :  { %s2136_s27 = scalar_lea.hbm %s2527_s2, 512 }
   0x5   :  { %p2137_p0 = scmp.ne.s32.totalorder %s2527_s2, %s2136_s27  ;;  %p2140_p1 = scmp.lt.u32.totalorder %s2136_s27, %s2527_s2 }
   0x7   :  { %p2142_p2 = pnand %p2140_p1, %p2137_p0 }
   0x9   :  { %2145 = shalt.err (!%p2142_p2)
}
   0xa   :  { %s2146_s8 = scalar_lea.vmem %s34_s22, 512  ;;  %p2151_p4 = scmp.lt.s32.totalorder %s34_s22, %s34_s22 }
   0xb   :  { %p2147_p3 = scmp.ne.s32.totalorder %s34_s22, %s2146_s8  ;;  %p2152_p5 = scmp.lt.s32.totalorder %s2146_s8, %s2146_s8 }
   0xd   :  { %p2153_p6 = por %p2152_p5, %p2151_p4 }
   0xf   :  { %p2154_p7 = pnand %p2153_p6, %p2147_p3 }
  0x11   :  { %2157 = shalt.err (!%p2154_p7)
}
  0x12   :  { %s2232_s9 = smov 128   ;;  %s2233_s10 = smov 8  }
  0x13   :  { %39 = dma.hbm_to_vmem [thread:$0]  %s2527_s2, 512, %s34_s22, [#allocation7], %s2232_s9, %s2232_s9, %s2233_s10  }
  0x14   :  { %s2158_s15 = scalar_lea.hbm %s2526_s1, 2048 }
  0x15   :  { %p2159_p8 = scmp.ne.s32.totalorder %s2526_s1, %s2158_s15  ;;  %p2162_p9 = scmp.lt.u32.totalorder %s2158_s15, %s2526_s1 }
  0x17   :  { %p2164_p10 = pnand %p2162_p9, %p2159_p8 }
  0x19   :  { %2167 = shalt.err (!%p2164_p10)
}
  0x1a   :  { %s2168_s20 = scalar_lea.vmem %s2278_s24, 2048  ;;  %p2173_p12 = scmp.lt.s32.totalorder %s2278_s24, %s2278_s24 }
  0x1b   :  { %p2169_p11 = scmp.ne.s32.totalorder %s2278_s24, %s2168_s20  ;;  %p2174_p13 = scmp.lt.s32.totalorder %s2168_s20, %s2168_s20 }
  0x1d   :  { %p2175_p0 = por %p2174_p13, %p2173_p12 }
  0x1f   :  { %p2176_p1 = pnand %p2175_p0, %p2169_p11 }
  0x21   :  { %2179 = shalt.err (!%p2176_p1)
}
  0x22   :  { %27 = dma.hbm_to_vmem [thread:$0]  %s2526_s1, 2048, %s2278_s24, [#allocation4], %s2232_s9, %s2232_s9, %s2233_s10  }
  0x23   :  { %s2234_s22 = smov [#allocation8]   ;;  %s2180_s27 = scalar_lea.hbm %s2528_s3, 16 }
  0x24   :  { %s46_s23 = sshll.u32 %s2234_s22, 4  ;;  %p2181_p2 = scmp.ne.s32.totalorder %s2528_s3, %s2180_s27  ;;  %s47_s23 = int_to_ptr.vmem [resolvable:$true] %s46_s23 }
  0x25   :  { %p2184_p3 = scmp.lt.u32.totalorder %s2180_s27, %s2528_s3 }
  0x27   :  { %p2186_p4 = pnand %p2184_p3, %p2181_p2 }
  0x29   :  { %2189 = shalt.err (!%p2186_p4)
}
  0x2a   :  { %s2190_s8 = scalar_lea.vmem %s47_s23, 16  ;;  %s2194_s1 = scalar_lea.vmem %s47_s23, 32 }
  0x2b   :  { %p2191_p5 = scmp.ne.s32.totalorder %s47_s23, %s2190_s8  ;;  %p2195_p6 = scmp.lt.s32.totalorder %s47_s23, %s47_s23 }
  0x2c   :  { %p2196_p7 = scmp.lt.s32.totalorder %s2194_s1, %s2190_s8 }
  0x2e   :  { %p2197_p8 = por %p2196_p7, %p2195_p6 }
  0x30   :  { %p2198_p9 = pnand %p2197_p8, %p2191_p5 }
  0x32   :  { %2201 = shalt.err (!%p2198_p9)
}
  0x33   :  { %49 = dma.hbm_to_vmem [thread:$0]  %s2528_s3, 16, %s47_s23, [#allocation7]  }
  0x34   :  { %2224 = dma.done.wait [#allocation4], 2048  }
  0x35   :  { %2225 = vsyncadd [#allocation4], 4294965248 }
  0x36   :  { %2226 = dma.done.wait [#allocation7], 528  }
  0x37   :  { %2227 = vsyncadd [#allocation7], 4294966768  ;;  %v2235_v0 = vmov 0   ;;  %v63_v1 = vld [vmem:[%s2525_s0] sm:$0xff]  ;;  %v79_v2 = vld [vmem:[#allocation3] sm:$0xff]  ;;  %v2236_v17 = vmov 0.0|0.0   ;;  %v65_v35 = vlaneseq }
  0x38   :  { %2071 = vset.pattern.permute.xlu0 %v2235_v0  ;;  %v80_v3 = vld [vmem:[#allocation3 + $0x8] sm:$0xff]  ;;  %v81_v4 = vld [vmem:[#allocation3 + $0x10] sm:$0xff]  ;;  %v82_v5 = vld [vmem:[#allocation3 + $0x18] sm:$0xff]  ;;  %1962 = vmatprep.subr.bf16.mxu1 %v2236_v17  ;;  %vm2237_vm0 = vmmov 0   ;;  %v2238_v20 = vmov 0.0   ;;  %v2239_v38 = vmov 1.0  }
  0x39   :  { %68 = vperm.xlu0 %2071, %v63_v1   ;;  %v64_v6 = vld [vmem:[%s2525_s0 + $0x8] sm:$0xff]  ;;  %v1930_v7 = vpack.c.bf16 %v80_v3, %v79_v2  ;;  %v1934_v8 = vpack.c.bf16 %v82_v5, %v81_v4  ;;  %v83_v9 = vld [vmem:[#allocation3 + $0x20] sm:$0xff]  ;;  %v84_v10 = vld [vmem:[#allocation3 + $0x28] sm:$0xff]  ;;  %1762 = vmatprep.mubr.msk.f32.mxu1 %vm2237_vm0, %v2238_v20  ;;  %v66_v36 = vand.u32 127, %v65_v35  ;;  %s2240_s0 = smov 64   ;;  %s2241_s3 = smov 32  }
  0x3a   :  { %v1938_v11 = vpack.c.bf16 %v84_v10, %v83_v9  ;;  %v179_v12 = vld [vmem:[#allocation6] sm:$0xff]  ;;  %v180_v13 = vld [vmem:[#allocation6 + $0x8] sm:$0xff]  ;;  %v181_v14 = vld [vmem:[#allocation6 + $0x10] sm:$0xff]  ;;  %vm189_vm3 = vcmask 261120  }
  0x3b   :  { %1931 = vmatprep.subr.bf16.mxu0 %v1930_v7  ;;  %v85_v15 = vld [vmem:[#allocation3 + $0x30] sm:$0xff]  ;;  %v86_v16 = vld [vmem:[#allocation3 + $0x38] sm:$0xff]  ;;  %v2334_v18 = vpack.c.bf16 %v180_v13, %v179_v12  ;;  %v87_v23 = vld [vmem:[#allocation3 + $0x40] sm:$0xff] }
  0x3c   :  { %1933 = vmatpush3.bf16.msra.mxu0 %v1930_v7  ;;  %v182_v19 = vld [vmem:[#allocation6 + $0x18] sm:$0xff]  ;;  %v1942_v22 = vpack.c.bf16 %v86_v16, %v85_v15  ;;  %v88_v24 = vld [vmem:[#allocation3 + $0x48] sm:$0xff]  ;;  %v89_v26 = vld [vmem:[#allocation3 + $0x50] sm:$0xff] }
  0x3d   :  { %71 = vperm.xlu0 %2071, %v64_v6   ;;  %1935 = vmatprep.subr.bf16.mxu0 %v1934_v8  ;;  %v2339_v21 = vpack.c.bf16 %v182_v19, %v181_v14  ;;  %v1946_v25 = vpack.c.bf16 %v88_v24, %v87_v23  ;;  %v90_v27 = vld [vmem:[#allocation3 + $0x58] sm:$0xff]  ;;  %v91_v29 = vld [vmem:[#allocation3 + $0x60] sm:$0xff]  ;;  %v92_v30 = vld [vmem:[#allocation3 + $0x68] sm:$0xff] }
  0x3e   :  { %1964 = vmatpush3.bf16.msra.mxu1 %v2334_v18  ;;  %v1950_v28 = vpack.c.bf16 %v90_v27, %v89_v26  ;;  %v1954_v31 = vpack.c.bf16 %v92_v30, %v91_v29  ;;  %v93_v32 = vld [vmem:[#allocation3 + $0x70] sm:$0xff]  ;;  %v94_v33 = vld [vmem:[#allocation3 + $0x78] sm:$0xff]  ;;  %v1594_v42 = vld [vmem:[#allocation8] ss:$0 sm:$0xff] }
  0x3f   :  { %1965 = vmatprep.subr.bf16.mxu1 %v2236_v17  ;;  %v1958_v34 = vpack.c.bf16 %v94_v33, %v93_v32  ;;  %v183_v59 = vld [vmem:[%s2529_s4] sm:$0xff]  ;;  %v184_v60 = vld [vmem:[%s2529_s4 + $0x8] sm:$0xff]  ;;  %v185_v61 = vld [vmem:[%s2529_s4 + $0x10] sm:$0xff] }
  0x40   :  { %1937 = vmatpush3.bf16.msra.mxu0 %v1934_v8  ;;  %v2365_v62 = vpack.c.bf16 %v184_v60, %v183_v59  ;;  %v186_v63 = vld [vmem:[%s2529_s4 + $0x18] sm:$0xff]  ;;  %v2395_v5 = vld [vmem:[%s2530_s5] ss:$0 sm:$0xff]  ;;  %s2242_s5 = smov [#allocation9]  }
  0x41   :  { %1939 = vmatprep.subr.bf16.mxu0 %v1938_v11  ;;  %v2371_v0 = vpack.c.bf16 %v186_v63, %v185_v61  ;;  %s1579_s25 = sshll.u32 %s2242_s5, 4  ;;  %s1580_s25 = int_to_ptr.vmem [resolvable:$true] %s1579_s25 }
  0x42   :  { %1967 = vmatpush3.bf16.msra.mxu1 %v2339_v21  ;;  %s2202_s26 = scalar_lea.vmem %s1580_s25, 256  ;;  %p2207_p11 = scmp.lt.s32.totalorder %s1580_s25, %s1580_s25 }
  0x43   :  { %1968 = vmatprep.subr.bf16.mxu1 %v2236_v17  ;;  %p2203_p10 = scmp.ne.s32.totalorder %s1580_s25, %s2202_s26  ;;  %p2208_p12 = scmp.lt.s32.totalorder %s2202_s26, %s2202_s26 }
  0x44   :  { %1941 = vmatpush3.bf16.msra.mxu0 %v1938_v11 }
  0x45   :  { %1943 = vmatprep.subr.bf16.mxu0 %v1942_v22  ;;  %1763 = vmatmul.mubr.f32.vlgmr.msra.gmra.mrb[0].mxu1 %v2238_v20  ;;  %p2209_p13 = por %p2208_p12, %p2207_p11 }
  0x46   :  { %1773 = vmatprep.mubr.msk.f32.mxu1 %vm2237_vm0, %v2238_v20  ;;  %1970 = vmatpush3.bf16.msra.mxu1 %v2365_v62 }
  0x47   :  { %1971 = vmatprep.subr.bf16.mxu1 %v2236_v17  ;;  %p2210_p0 = pnand %p2209_p13, %p2203_p10 }
  0x48   :  { %1945 = vmatpush3.bf16.msra.mxu0 %v1942_v22 }
  0x49   :  { %1947 = vmatprep.subr.bf16.mxu0 %v1946_v25 }
  0x4a   :  { %1973 = vmatpush3.bf16.msra.mxu1 %v2371_v0 }
  0x4b   :  { %1974 = vmatprep.subr.bf16.mxu1 %v2236_v17 }
  0x4c   :  { %1949 = vmatpush3.bf16.msra.mxu0 %v1946_v25 }
  0x4d   :  { %1951 = vmatprep.subr.bf16.mxu0 %v1950_v28 }
  0x50   :  { %1953 = vmatpush3.bf16.msra.mxu0 %v1950_v28 }
  0x51   :  { %1955 = vmatprep.subr.bf16.mxu0 %v1954_v31 }
  0x54   :  { %1957 = vmatpush3.bf16.msra.mxu0 %v1954_v31 }
  0x55   :  { %1959 = vmatprep.subr.bf16.mxu0 %v1958_v34 }
  0x58   :  { %1961 = vmatpush3.bf16.msra.mxu0 %v1958_v34 }
  0x59   :  { %1986 = vmatprep.subr.bf16.mxu0 %v2236_v17 }
  0xb8   :  { %v69_v37 = vpop.permute.xlu0 %68 }
  0xb9   :  { %vm73_vm1 = vcmp.eq.s32.totalorder %v69_v37, %v66_v36 }
  0xba   :  { %1751 = vmatprep.mubr.msk.f32.mxu0 %vm73_vm1, %v2239_v38 }
  0xbc   :  { %v72_v39 = vpop.permute.xlu0 %71 }
  0xbd   :  { %vm74_vm2 = vcmp.eq.s32.totalorder %v72_v39, %v66_v36 }
  0xbe   :  { %1752 = vmatmul.mubr.msk.f32.vlgmr.msra.gmra.mrb[0].mxu0 %vm74_vm2, %v2239_v38 }
  0xbf   :  { %1988 = vmatpush3.bf16.msra.mxu0 %v2334_v18  ;;  %1806 = vmatprep.mubr.msk.f32.mxu0 %vm2237_vm0, %v2238_v20 }
  0xc0   :  { %1989 = vmatprep.subr.bf16.mxu0 %v2236_v17 }
  0xc3   :  { %1991 = vmatpush3.bf16.msra.mxu0 %v2339_v21 }
  0xc4   :  { %1998 = vmatprep.subr.bf16.mxu0 %v2236_v17 }
 0x118   :  { %v259_v40 = vpop.f32.mrb[0].mxu1 }
 0x119   :  { %v1764_v41 = vpop.f32.mrb[1].mxu1 }
 0x191   :  { %v1753_v43 = vpop.f32.mrb[0].mxu0 }
 0x192   :  { %v174_v44 = vadd.f32 %v1753_v43, %v1594_v42  ;;  %v168_v45 = vpop.f32.mrb[1].mxu0 }
 0x193   :  { %v169_v46 = vadd.f32 %v1594_v42, %v168_v45 }
 0x194   :  { %178 = vst [vmem:[#allocation2 + $0x8] sm:$0xff] %v174_v44 }
 0x195   :  { %177 = vst [vmem:[#allocation2] sm:$0xff] %v169_v46 }
 0x19c   :  { %v188_v47 = vld [vmem:[#allocation2] sm:$0x3]  ;;  %v370_v9 = vld [vmem:[#allocation2 + $0x2] sm:$0x3]  ;;  %v542_v32 = vld [vmem:[#allocation2 + $0x4] sm:$0x3] }
 0x19d   :  { %v263_v48 = vadd.f32 %v259_v40, %v188_v47 }
 0x19f   :  { %2072 = vtanh.f32 %v263_v48  ;;  %v1597_v50 = vmul.f32 -1.442695, %v263_v48 }
 0x1a1   :  { %2074 = vpow2.f32 %v1597_v50 }
 0x1a9   :  { %v2073_v49 = vpop.eup %2072 }
 0x1aa   :  { %273 = vrot.lane.b32.xlu1 %v2073_v49, %s2240_s0 }
 0x1ab   :  { %v2075_v51 = vpop.eup %2074 }
 0x1ac   :  { %v267_v52 = vadd.f32 1.0, %v2075_v51 }
 0x1ae   :  { %2076 = vrcp.f32 %v267_v52 }
 0x1b8   :  { %v2077_v53 = vpop.eup %2076 }
 0x1b9   :  { %v271_v56 = vmul.f32 0.0, %v2077_v53 }
 0x21c   :  { %v274_v54 = vpop.permute.xlu1 %273 }
 0x21d   :  { %v276_v55 = vmul.f32 %v2077_v53, %v274_v54 }
 0x21f   :  { %278 = vrot.lane.b32.xlu1 %v276_v55, %s2241_s3 }
 0x291   :  { %v279_v57 = vpop.permute.xlu1 %278 }
 0x292   :  { %v281_v58 = vadd.f32 %v279_v57, %v271_v56 }
 0x294   :  { %2078 = vtanh.f32 %v281_v58 }
 0x29e   :  { %v2079_v1 = vpop.eup %2078 }
 0x29f   :  { %284 = vrot.lane.b32.xlu0 %v2079_v1, %s2240_s0 }
 0x311   :  { %v285_v2 = vpop.permute.xlu0 %284 }
 0x312   :  { %v287_v3 = vmul.f32 %v2077_v53, %v285_v2  ;;  %v714_v53 = vld [vmem:[#allocation2 + $0x6] sm:$0x3] }
 0x314   :  { %295 = vrot.lane.b32.xlu1 %v287_v3, %s2241_s3 }
 0x386   :  { %v296_v4 = vpop.permute.xlu1 %295 }
 0x387   :  { %1774 = vmatmul.mubr.msk.f32.vlgmr.msra.gmra.mrb[2].mxu1 %vm189_vm3, %v296_v4 }
 0x388   :  { %1976 = vmatpush3.bf16.msra.mxu1 %v2334_v18  ;;  %1784 = vmatprep.mubr.msk.f32.mxu1 %vm2237_vm0, %v2238_v20 }
 0x389   :  { %1977 = vmatprep.subr.bf16.mxu1 %v2236_v17 }
 0x38c   :  { %1979 = vmatpush3.bf16.msra.mxu1 %v2339_v21 }
 0x38d   :  { %1980 = vmatprep.subr.bf16.mxu1 %v2236_v17 }
 0x38f   :  { %1785 = vmatmul.mubr.msk.f32.vlgmr.msra.gmra.mrb[4].mxu1 %vm189_vm3, %v296_v4 }
 0x390   :  { %1982 = vmatpush3.bf16.msra.mxu1 %v2365_v62  ;;  %1795 = vmatprep.mubr.msk.f32.mxu1 %vm2237_vm0, %v2238_v20 }
 0x391   :  { %1983 = vmatprep.subr.bf16.mxu1 %v2236_v17 }
 0x394   :  { %1985 = vmatpush3.bf16.msra.mxu1 %v2371_v0 }
 0x395   :  { %1992 = vmatprep.subr.bf16.mxu1 %v2236_v17 }
 0x45a   :  { %v365_v6 = vpop.f32.mrb[2].mxu1 }
 0x45b   :  { %v366_v7 = vadd.f32 %v2395_v5, %v365_v6  ;;  %v1775_v8 = vpop.f32.mrb[3].mxu1 }
 0x45d   :  { %369 = vst [vmem:[#allocation9] sm:$0x3] %v366_v7 }
 0x462   :  { %v437_v10 = vpop.f32.mrb[4].mxu1 }
 0x463   :  { %v441_v11 = vadd.f32 %v437_v10, %v370_v9  ;;  %v1786_v12 = vpop.f32.mrb[5].mxu1 }
 0x465   :  { %2080 = vtanh.f32 %v441_v11  ;;  %v1601_v14 = vmul.f32 -1.442695, %v441_v11 }
 0x467   :  { %2082 = vpow2.f32 %v1601_v14 }
 0x46f   :  { %v2081_v13 = vpop.eup %2080 }
 0x470   :  { %451 = vrot.lane.b32.xlu0 %v2081_v13, %s2240_s0  ;;  %v886_v13 = vld [vmem:[#allocation2 + $0x8] sm:$0x3] }
 0x471   :  { %v2083_v15 = vpop.eup %2082 }
 0x472   :  { %v445_v16 = vadd.f32 1.0, %v2083_v15 }
 0x474   :  { %2084 = vrcp.f32 %v445_v16 }
 0x47e   :  { %v2085_v19 = vpop.eup %2084 }
 0x47f   :  { %v449_v24 = vmul.f32 %v2085_v19, %v281_v58 }
 0x4e2   :  { %v452_v22 = vpop.permute.xlu0 %451 }
 0x4e3   :  { %v454_v23 = vmul.f32 %v2085_v19, %v452_v22 }
 0x4e5   :  { %456 = vrot.lane.b32.xlu1 %v454_v23, %s2241_s3 }
 0x557   :  { %v457_v25 = vpop.permute.xlu1 %456 }
 0x558   :  { %v459_v26 = vadd.f32 %v457_v25, %v449_v24 }
 0x55a   :  { %2086 = vtanh.f32 %v459_v26 }
 0x564   :  { %v2087_v27 = vpop.eup %2086 }
 0x565   :  { %462 = vrot.lane.b32.xlu0 %v2087_v27, %s2240_s0 }
 0x5d7   :  { %v463_v28 = vpop.permute.xlu0 %462 }
 0x5d8   :  { %v465_v29 = vmul.f32 %v2085_v19, %v463_v28 }
 0x5da   :  { %467 = vrot.lane.b32.xlu1 %v465_v29, %s2241_s3 }
 0x64c   :  { %v468_v30 = vpop.permute.xlu1 %467 }
 0x64d   :  { %1796 = vmatmul.mubr.msk.f32.vlgmr.msra.gmra.mrb[6].mxu1 %vm189_vm3, %v468_v30  ;;  %1807 = vmatmul.mubr.msk.f32.vlgmr.msra.gmra.mrb[2].mxu0 %vm189_vm3, %v468_v30 }
 0x64e   :  { %1994 = vmatpush3.bf16.msra.mxu1 %v2365_v62  ;;  %2000 = vmatpush3.bf16.msra.mxu0 %v2334_v18 }
 0x64f   :  { %1995 = vmatprep.subr.bf16.mxu1 %v2236_v17  ;;  %2001 = vmatprep.subr.bf16.mxu0 %v2236_v17 }
 0x650   :  { %1828 = vmatprep.mubr.msk.f32.mxu0 %vm2237_vm0, %v2238_v20  ;;  %1817 = vmatprep.mubr.msk.f32.mxu1 %vm2237_vm0, %v2238_v20 }
 0x652   :  { %1997 = vmatpush3.bf16.msra.mxu1 %v2371_v0  ;;  %2003 = vmatpush3.bf16.msra.mxu0 %v2339_v21 }
 0x653   :  { %2004 = vmatprep.subr.bf16.mxu1 %v2236_v17  ;;  %2010 = vmatprep.subr.bf16.mxu0 %v2236_v17 }
 0x720   :  { %v537_v31 = vpop.f32.mrb[6].mxu1  ;;  %v609_v33 = vpop.f32.mrb[2].mxu0 }
 0x721   :  { %v538_v34 = vadd.f32 %v2395_v5, %v537_v31  ;;  %v613_v35 = vadd.f32 %v609_v33, %v542_v32  ;;  %v1797_v36 = vpop.f32.mrb[7].mxu1  ;;  %v1808_v37 = vpop.f32.mrb[3].mxu0 }
 0x723   :  { %541 = vst [vmem:[#allocation9 + $0x2] sm:$0x3] %v538_v34  ;;  %2088 = vtanh.f32 %v613_v35  ;;  %v1604_v39 = vmul.f32 -1.442695, %v613_v35 }
 0x725   :  { %2090 = vpow2.f32 %v1604_v39 }
 0x72d   :  { %v2089_v38 = vpop.eup %2088 }
 0x72e   :  { %623 = vrot.lane.b32.xlu0 %v2089_v38, %s2240_s0  ;;  %v1058_v38 = vld [vmem:[#allocation2 + $0xa] sm:$0x3] }
 0x72f   :  { %v2091_v40 = vpop.eup %2090 }
 0x730   :  { %v617_v41 = vadd.f32 1.0, %v2091_v40 }
 0x732   :  { %2092 = vrcp.f32 %v617_v41 }
 0x73c   :  { %v2093_v42 = vpop.eup %2092 }
 0x73d   :  { %v621_v45 = vmul.f32 %v2093_v42, %v459_v26 }
 0x7a0   :  { %v624_v43 = vpop.permute.xlu0 %623 }
 0x7a1   :  { %v626_v44 = vmul.f32 %v2093_v42, %v624_v43 }
 0x7a3   :  { %628 = vrot.lane.b32.xlu1 %v626_v44, %s2241_s3 }
 0x815   :  { %v629_v46 = vpop.permute.xlu1 %628 }
 0x816   :  { %v631_v47 = vadd.f32 %v629_v46, %v621_v45 }
 0x818   :  { %2094 = vtanh.f32 %v631_v47 }
 0x822   :  { %v2095_v48 = vpop.eup %2094 }
 0x823   :  { %634 = vrot.lane.b32.xlu0 %v2095_v48, %s2240_s0 }
 0x895   :  { %v635_v49 = vpop.permute.xlu0 %634 }
 0x896   :  { %v637_v50 = vmul.f32 %v2093_v42, %v635_v49 }
 0x898   :  { %639 = vrot.lane.b32.xlu1 %v637_v50, %s2241_s3 }
 0x90a   :  { %v640_v51 = vpop.permute.xlu1 %639 }
 0x90b   :  { %1818 = vmatmul.mubr.msk.f32.vlgmr.msra.gmra.mrb[8].mxu1 %vm189_vm3, %v640_v51  ;;  %1829 = vmatmul.mubr.msk.f32.vlgmr.msra.gmra.mrb[4].mxu0 %vm189_vm3, %v640_v51 }
 0x90c   :  { %2006 = vmatpush3.bf16.msra.mxu1 %v2365_v62  ;;  %2012 = vmatpush3.bf16.msra.mxu0 %v2334_v18 }
 0x90d   :  { %2007 = vmatprep.subr.bf16.mxu1 %v2236_v17  ;;  %2013 = vmatprep.subr.bf16.mxu0 %v2236_v17 }
 0x90e   :  { %1850 = vmatprep.mubr.msk.f32.mxu0 %vm2237_vm0, %v2238_v20  ;;  %1839 = vmatprep.mubr.msk.f32.mxu1 %vm2237_vm0, %v2238_v20 }
 0x910   :  { %2009 = vmatpush3.bf16.msra.mxu1 %v2371_v0  ;;  %2015 = vmatpush3.bf16.msra.mxu0 %v2339_v21 }
 0x911   :  { %2016 = vmatprep.subr.bf16.mxu1 %v2236_v17  ;;  %2022 = vmatprep.subr.bf16.mxu0 %v2236_v17 }
 0x9de   :  { %v709_v52 = vpop.f32.mrb[8].mxu1  ;;  %v781_v54 = vpop.f32.mrb[4].mxu0 }
 0x9df   :  { %v710_v55 = vadd.f32 %v2395_v5, %v709_v52  ;;  %v785_v56 = vadd.f32 %v781_v54, %v714_v53  ;;  %v1819_v57 = vpop.f32.mrb[9].mxu1  ;;  %v1830_v58 = vpop.f32.mrb[5].mxu0 }
 0x9e1   :  { %713 = vst [vmem:[#allocation9 + $0x4] sm:$0x3] %v710_v55  ;;  %2096 = vtanh.f32 %v785_v56  ;;  %v1607_v60 = vmul.f32 -1.442695, %v785_v56 }
 0x9e3   :  { %2098 = vpow2.f32 %v1607_v60 }
 0x9eb   :  { %v2097_v59 = vpop.eup %2096 }
 0x9ec   :  { %795 = vrot.lane.b32.xlu0 %v2097_v59, %s2240_s0  ;;  %v1230_v59 = vld [vmem:[#allocation2 + $0xc] sm:$0x3] }
 0x9ed   :  { %v2099_v61 = vpop.eup %2098 }
 0x9ee   :  { %v789_v63 = vadd.f32 1.0, %v2099_v61 }
 0x9f0   :  { %2100 = vrcp.f32 %v789_v63 }
 0x9fa   :  { %v2101_v1 = vpop.eup %2100 }
 0x9fb   :  { %v793_v4 = vmul.f32 %v2101_v1, %v631_v47 }
 0xa5e   :  { %v796_v2 = vpop.permute.xlu0 %795 }
 0xa5f   :  { %v798_v3 = vmul.f32 %v2101_v1, %v796_v2 }
 0xa61   :  { %800 = vrot.lane.b32.xlu1 %v798_v3, %s2241_s3 }
 0xad3   :  { %v801_v6 = vpop.permute.xlu1 %800 }
 0xad4   :  { %v803_v7 = vadd.f32 %v801_v6, %v793_v4 }
 0xad6   :  { %2102 = vtanh.f32 %v803_v7 }
 0xae0   :  { %v2103_v8 = vpop.eup %2102 }
 0xae1   :  { %806 = vrot.lane.b32.xlu0 %v2103_v8, %s2240_s0 }
 0xb53   :  { %v807_v9 = vpop.permute.xlu0 %806 }
 0xb54   :  { %v809_v10 = vmul.f32 %v2101_v1, %v807_v9 }
 0xb56   :  { %811 = vrot.lane.b32.xlu1 %v809_v10, %s2241_s3 }
 0xbc8   :  { %v812_v11 = vpop.permute.xlu1 %811 }
 0xbc9   :  { %1840 = vmatmul.mubr.msk.f32.vlgmr.msra.gmra.mrb[10].mxu1 %vm189_vm3, %v812_v11  ;;  %1851 = vmatmul.mubr.msk.f32.vlgmr.msra.gmra.mrb[6].mxu0 %vm189_vm3, %v812_v11 }
 0xbca   :  { %2018 = vmatpush3.bf16.msra.mxu1 %v2365_v62  ;;  %2024 = vmatpush3.bf16.msra.mxu0 %v2334_v18 }
 0xbcb   :  { %2019 = vmatprep.subr.bf16.mxu1 %v2236_v17  ;;  %2025 = vmatprep.subr.bf16.mxu0 %v2236_v17 }
 0xbcc   :  { %1872 = vmatprep.mubr.msk.f32.mxu0 %vm2237_vm0, %v2238_v20  ;;  %1861 = vmatprep.mubr.msk.f32.mxu1 %vm2237_vm0, %v2238_v20 }
 0xbce   :  { %2021 = vmatpush3.bf16.msra.mxu1 %v2371_v0  ;;  %2027 = vmatpush3.bf16.msra.mxu0 %v2339_v21 }
 0xbcf   :  { %2028 = vmatprep.subr.bf16.mxu1 %v2236_v17  ;;  %2034 = vmatprep.subr.bf16.mxu0 %v2236_v17 }
 0xc9c   :  { %v881_v12 = vpop.f32.mrb[10].mxu1  ;;  %v953_v14 = vpop.f32.mrb[6].mxu0 }
 0xc9d   :  { %v882_v15 = vadd.f32 %v2395_v5, %v881_v12  ;;  %v957_v16 = vadd.f32 %v953_v14, %v886_v13  ;;  %v1841_v19 = vpop.f32.mrb[11].mxu1  ;;  %v1852_v22 = vpop.f32.mrb[7].mxu0 }
 0xc9e   :  { %v1402_v19 = vld [vmem:[#allocation2 + $0xe] sm:$0x3] }
 0xc9f   :  { %885 = vst [vmem:[#allocation9 + $0x6] sm:$0x3] %v882_v15  ;;  %2104 = vtanh.f32 %v957_v16  ;;  %v1610_v24 = vmul.f32 -1.442695, %v957_v16 }
 0xca1   :  { %2106 = vpow2.f32 %v1610_v24 }
 0xca9   :  { %v2105_v23 = vpop.eup %2104 }
 0xcaa   :  { %967 = vrot.lane.b32.xlu0 %v2105_v23, %s2240_s0 }
 0xcab   :  { %v2107_v25 = vpop.eup %2106 }
 0xcac   :  { %v961_v26 = vadd.f32 1.0, %v2107_v25 }
 0xcae   :  { %2108 = vrcp.f32 %v961_v26 }
 0xcb8   :  { %v2109_v27 = vpop.eup %2108 }
 0xcb9   :  { %v965_v30 = vmul.f32 %v2109_v27, %v803_v7 }
 0xd1c   :  { %v968_v28 = vpop.permute.xlu0 %967 }
 0xd1d   :  { %v970_v29 = vmul.f32 %v2109_v27, %v968_v28 }
 0xd1f   :  { %972 = vrot.lane.b32.xlu1 %v970_v29, %s2241_s3 }
 0xd91   :  { %v973_v31 = vpop.permute.xlu1 %972 }
 0xd92   :  { %v975_v32 = vadd.f32 %v973_v31, %v965_v30 }
 0xd94   :  { %2110 = vtanh.f32 %v975_v32 }
 0xd9e   :  { %v2111_v33 = vpop.eup %2110 }
 0xd9f   :  { %978 = vrot.lane.b32.xlu0 %v2111_v33, %s2240_s0 }
 0xe11   :  { %v979_v34 = vpop.permute.xlu0 %978 }
 0xe12   :  { %v981_v35 = vmul.f32 %v2109_v27, %v979_v34 }
 0xe14   :  { %983 = vrot.lane.b32.xlu1 %v981_v35, %s2241_s3 }
 0xe86   :  { %v984_v36 = vpop.permute.xlu1 %983 }
 0xe87   :  { %1862 = vmatmul.mubr.msk.f32.vlgmr.msra.gmra.mrb[12].mxu1 %vm189_vm3, %v984_v36  ;;  %1873 = vmatmul.mubr.msk.f32.vlgmr.msra.gmra.mrb[8].mxu0 %vm189_vm3, %v984_v36 }
 0xe88   :  { %2030 = vmatpush3.bf16.msra.mxu1 %v2365_v62  ;;  %2036 = vmatpush3.bf16.msra.mxu0 %v2334_v18 }
 0xe89   :  { %2031 = vmatprep.subr.bf16.mxu1 %v2236_v17  ;;  %2037 = vmatprep.subr.bf16.mxu0 %v2236_v17 }
 0xe8a   :  { %1894 = vmatprep.mubr.msk.f32.mxu0 %vm2237_vm0, %v2238_v20  ;;  %1883 = vmatprep.mubr.msk.f32.mxu1 %vm2237_vm0, %v2238_v20 }
 0xe8c   :  { %2033 = vmatpush3.bf16.msra.mxu1 %v2371_v0  ;;  %2039 = vmatpush3.bf16.msra.mxu0 %v2339_v21 }
 0xe8d   :  { %2040 = vmatprep.subr.bf16.mxu1 %v2236_v17  ;;  %2046 = vmatprep.subr.bf16.mxu0 %v2236_v17 }
 0xf5a   :  { %v1053_v37 = vpop.f32.mrb[12].mxu1  ;;  %v1125_v39 = vpop.f32.mrb[8].mxu0 }
 0xf5b   :  { %v1054_v40 = vadd.f32 %v2395_v5, %v1053_v37  ;;  %v1129_v41 = vadd.f32 %v1125_v39, %v1058_v38  ;;  %v1863_v42 = vpop.f32.mrb[13].mxu1  ;;  %v1874_v43 = vpop.f32.mrb[9].mxu0 }
 0xf5d   :  { %1057 = vst [vmem:[#allocation9 + $0x8] sm:$0x3] %v1054_v40  ;;  %2112 = vtanh.f32 %v1129_v41  ;;  %v1613_v45 = vmul.f32 -1.442695, %v1129_v41 }
 0xf5f   :  { %2114 = vpow2.f32 %v1613_v45 }
 0xf67   :  { %v2113_v44 = vpop.eup %2112 }
 0xf68   :  { %1139 = vrot.lane.b32.xlu0 %v2113_v44, %s2240_s0 }
 0xf69   :  { %v2115_v46 = vpop.eup %2114 }
 0xf6a   :  { %v1133_v47 = vadd.f32 1.0, %v2115_v46 }
 0xf6c   :  { %2116 = vrcp.f32 %v1133_v47 }
 0xf76   :  { %v2117_v48 = vpop.eup %2116 }
 0xf77   :  { %v1137_v51 = vmul.f32 %v2117_v48, %v975_v32 }
 0xfda   :  { %v1140_v49 = vpop.permute.xlu0 %1139 }
 0xfdb   :  { %v1142_v50 = vmul.f32 %v2117_v48, %v1140_v49 }
 0xfdd   :  { %1144 = vrot.lane.b32.xlu1 %v1142_v50, %s2241_s3 }
0x104f   :  { %v1145_v52 = vpop.permute.xlu1 %1144 }
0x1050   :  { %v1147_v53 = vadd.f32 %v1145_v52, %v1137_v51 }
0x1052   :  { %2118 = vtanh.f32 %v1147_v53 }
0x105c   :  { %v2119_v54 = vpop.eup %2118 }
0x105d   :  { %1150 = vrot.lane.b32.xlu0 %v2119_v54, %s2240_s0 }
0x10cf   :  { %v1151_v55 = vpop.permute.xlu0 %1150 }
0x10d0   :  { %v1153_v56 = vmul.f32 %v2117_v48, %v1151_v55 }
0x10d2   :  { %1155 = vrot.lane.b32.xlu1 %v1153_v56, %s2241_s3 }
0x1144   :  { %v1156_v57 = vpop.permute.xlu1 %1155 }
0x1145   :  { %1884 = vmatmul.mubr.msk.f32.vlgmr.msra.gmra.mrb[14].mxu1 %vm189_vm3, %v1156_v57  ;;  %1895 = vmatmul.mubr.msk.f32.vlgmr.msra.gmra.mrb[10].mxu0 %vm189_vm3, %v1156_v57 }
0x1146   :  { %2042 = vmatpush3.bf16.msra.mxu1 %v2365_v62  ;;  %2048 = vmatpush3.bf16.msra.mxu0 %v2334_v18 }
0x1147   :  { %2043 = vmatprep.subr.bf16.mxu1 %v2236_v17  ;;  %2049 = vmatprep.subr.bf16.mxu0 %v2236_v17 }
0x1148   :  { %1916 = vmatprep.mubr.msk.f32.mxu0 %vm2237_vm0, %v2238_v20  ;;  %1905 = vmatprep.mubr.msk.f32.mxu1 %vm2237_vm0, %v2238_v20 }
0x114a   :  { %2045 = vmatpush3.bf16.msra.mxu1 %v2371_v0  ;;  %2051 = vmatpush3.bf16.msra.mxu0 %v2339_v21 }
0x114b   :  { %2052 = vmatprep.subr.bf16.mxu1 %v2236_v17 }
0x1218   :  { %v1225_v58 = vpop.f32.mrb[14].mxu1  ;;  %v1297_v60 = vpop.f32.mrb[10].mxu0 }
0x1219   :  { %v1226_v18 = vadd.f32 %v2395_v5, %v1225_v58  ;;  %v1301_v61 = vadd.f32 %v1297_v60, %v1230_v59  ;;  %v1885_v63 = vpop.f32.mrb[15].mxu1  ;;  %v1896_v1 = vpop.f32.mrb[11].mxu0 }
0x121b   :  { %1229 = vst [vmem:[#allocation9 + $0xa] sm:$0x3] %v1226_v18  ;;  %2120 = vtanh.f32 %v1301_v61  ;;  %v1616_v3 = vmul.f32 -1.442695, %v1301_v61 }
0x121d   :  { %2122 = vpow2.f32 %v1616_v3 }
0x1225   :  { %v2121_v2 = vpop.eup %2120 }
0x1226   :  { %1311 = vrot.lane.b32.xlu0 %v2121_v2, %s2240_s0 }
0x1227   :  { %v2123_v4 = vpop.eup %2122 }
0x1228   :  { %v1305_v6 = vadd.f32 1.0, %v2123_v4 }
0x122a   :  { %2124 = vrcp.f32 %v1305_v6 }
0x1234   :  { %v2125_v21 = vpop.eup %2124 }
0x1235   :  { %v1309_v9 = vmul.f32 %v2125_v21, %v1147_v53 }
0x1298   :  { %v1312_v7 = vpop.permute.xlu0 %1311 }
0x1299   :  { %v1314_v8 = vmul.f32 %v2125_v21, %v1312_v7 }
0x129b   :  { %1316 = vrot.lane.b32.xlu1 %v1314_v8, %s2241_s3 }
0x130d   :  { %v1317_v10 = vpop.permute.xlu1 %1316 }
0x130e   :  { %v1319_v11 = vadd.f32 %v1317_v10, %v1309_v9 }
0x1310   :  { %2126 = vtanh.f32 %v1319_v11 }
0x131a   :  { %v2127_v12 = vpop.eup %2126 }
0x131b   :  { %1322 = vrot.lane.b32.xlu0 %v2127_v12, %s2240_s0 }
0x138d   :  { %v1323_v13 = vpop.permute.xlu0 %1322 }
0x138e   :  { %v1325_v14 = vmul.f32 %v2125_v21, %v1323_v13 }
0x1390   :  { %1327 = vrot.lane.b32.xlu1 %v1325_v14, %s2241_s3 }
0x1402   :  { %v1328_v15 = vpop.permute.xlu1 %1327 }
0x1403   :  { %1906 = vmatmul.mubr.msk.f32.vlgmr.msra.gmra.mrb[16].mxu1 %vm189_vm3, %v1328_v15  ;;  %1917 = vmatmul.mubr.msk.f32.vlgmr.msra.gmra.mrb[12].mxu0 %vm189_vm3, %v1328_v15 }
0x1404   :  { %2054 = vmatpush3.bf16.msra.mxu1 %v2365_v62  ;;  %1927 = vmatprep.mubr.msk.f32.mxu1 %vm2237_vm0, %v2238_v20 }
0x1405   :  { %2055 = vmatprep.subr.bf16.mxu1 %v2236_v17 }
0x1408   :  { %2057 = vmatpush3.bf16.msra.mxu1 %v2371_v0 }
0x14d6   :  { %v1397_v16 = vpop.f32.mrb[16].mxu1  ;;  %v1469_v22 = vpop.f32.mrb[12].mxu0 }
0x14d7   :  { %v1398_v23 = vadd.f32 %v2395_v5, %v1397_v16  ;;  %v1473_v24 = vadd.f32 %v1469_v22, %v1402_v19  ;;  %v1907_v25 = vpop.f32.mrb[17].mxu1  ;;  %v1918_v26 = vpop.f32.mrb[13].mxu0 }
0x14d9   :  { %1401 = vst [vmem:[#allocation9 + $0xc] sm:$0x3] %v1398_v23  ;;  %2128 = vtanh.f32 %v1473_v24  ;;  %v1619_v62 = vmul.f32 -1.442695, %v1473_v24 }
0x14db   :  { %2130 = vpow2.f32 %v1619_v62 }
0x14e3   :  { %v2129_v27 = vpop.eup %2128 }
0x14e4   :  { %1483 = vrot.lane.b32.xlu0 %v2129_v27, %s2240_s0 }
0x14e5   :  { %v2131_v20 = vpop.eup %2130 }
0x14e6   :  { %v1477_v28 = vadd.f32 1.0, %v2131_v20 }
0x14e8   :  { %2132 = vrcp.f32 %v1477_v28 }
0x14f2   :  { %v2133_v17 = vpop.eup %2132 }
0x14f3   :  { %v1481_v30 = vmul.f32 %v2133_v17, %v1319_v11 }
0x1556   :  { %v1484_v0 = vpop.permute.xlu0 %1483 }
0x1557   :  { %v1486_v29 = vmul.f32 %v2133_v17, %v1484_v0 }
0x1559   :  { %1488 = vrot.lane.b32.xlu1 %v1486_v29, %s2241_s3 }
0x15cb   :  { %v1489_v31 = vpop.permute.xlu1 %1488 }
0x15cc   :  { %v1491_v32 = vadd.f32 %v1489_v31, %v1481_v30 }
0x15ce   :  { %2134 = vtanh.f32 %v1491_v32 }
0x15d8   :  { %v2135_v33 = vpop.eup %2134 }
0x15d9   :  { %1494 = vrot.lane.b32.xlu0 %v2135_v33, %s2240_s0 }
0x164b   :  { %v1495_v34 = vpop.permute.xlu0 %1494 }
0x164c   :  { %v1497_v35 = vmul.f32 %v2133_v17, %v1495_v34 }
0x164e   :  { %1499 = vrot.lane.b32.xlu1 %v1497_v35, %s2241_s3 }
0x16c0   :  { %v1500_v36 = vpop.permute.xlu1 %1499 }
0x16c1   :  { %1928 = vmatmul.mubr.msk.f32.vlgmr.msra.gmra.mrb[18].mxu1 %vm189_vm3, %v1500_v36 }
0x1794   :  { %v1569_v37 = vpop.f32.mrb[18].mxu1 }
0x1795   :  { %v1570_v38 = vadd.f32 %v2395_v5, %v1569_v37  ;;  %v1929_v39 = vpop.f32.mrb[19].mxu1 }
0x1797   :  { %1573 = vst [vmem:[#allocation9 + $0xe] sm:$0x3] %v1570_v38 }
0x1798   :  { %2213 = shalt.err (!%p2210_p0)
}
0x1799   :  { %s2214_s29 = scalar_lea.hbm %s2531_s6, 256 }
0x179a   :  { %p2215_p1 = scmp.ne.s32.totalorder %s2531_s6, %s2214_s29  ;;  %p2218_p2 = scmp.lt.u32.totalorder %s2214_s29, %s2531_s6 }
0x179c   :  { %p2220_p3 = pnand %p2218_p2, %p2215_p1 }
0x179e   :  { %2223 = shalt.err (!%p2220_p3)
}
0x179f   :  { %1585 = dma.vmem_to_hbm [thread:$0]  %s1580_s25, 256, %s2531_s6, [#allocation5], %s2232_s9, %s2232_s9, %s2233_s10  }
0x17a0   :  { %2228 = dma.done.wait [#allocation5], 256  }
0x17a1   :  { %2229 = vsyncadd [#allocation5], 4294967040 }
0x17a2   :  { %1589 = vsyncpa [#allocation4], 1 }
0x17a3   :  { %1590 = vsyncpa [#allocation7], 1 }
0x17a4   :  { %1591 = vsyncpa [#allocation5], 1 }

</bundles_post_ra>
